<compile_context>
chip_gen: v7x
topology: tpu7x:2x2x1
jax: 0.10.0
libtpu: 0.0.40
codegen_flags: <defaults>
</compile_context>

<pallas_src>
import jax
import jax.numpy as jnp
from jax.experimental import pallas as pl
from jax.experimental.pallas import tpu as pltpu

_LANE = 128       # vreg lane width (last dim)
_SUBLANE = 8      # vreg sublane width (second-last dim)
_NEG_BIG = -1e30  # bias fill for padded class lanes -> exp() underflows to 0


def _round_up(x: int, m: int) -> int:
    return ((x + m - 1) // m) * m


def _vmem_limit_bytes() -> int:
    """Generation-aware scoped-VMEM limit: ~75% of physical, capped at 100 MiB.
    v5e/v6e (128 MiB physical) -> 96 MiB; v7x (64 MiB per TC) -> 48 MiB."""
    phys = 128 << 20
    try:
        cap = getattr(pltpu.get_tpu_info(), "vmem_capacity_bytes", None)
        if cap:
            phys = int(cap)
    except Exception:
        pass
    return max(min((phys * 3) // 4, 100 << 20), 16 << 20)


def _pick_row_tile(d: int, cp: int, itemsize: int, budget: int):
    """Largest power-of-two row tile whose working set fits `budget`, or None if
    W cannot be VMEM-resident even at TN=8 (callers then fall back to K-tiling)."""
    resident = 2 * d * cp * itemsize + 2 * cp * 4   # W, B (counted double-buffered)
    tn = 1024
    while tn >= _SUBLANE:
        need = (resident
                + 2 * tn * d * itemsize             # X tile, double-buffered
                + 2 * tn * cp * 4                   # out tile (f32), double-buffered
                + 2 * tn * cp * 4)                  # logits + exp f32 temporaries
        if need <= budget:
            return tn
        tn //= 2
    return None


def _pick_ktiled_row_tile(tk: int, cp: int, itemsize: int, budget: int) -> int:
    tn = 1024
    while tn >= _SUBLANE:
        need = (2 * tk * cp * itemsize + 2 * cp * 4  # W K-slab, B (double-buffered)
                + 2 * tn * tk * itemsize             # X tile, double-buffered
                + tn * cp * 4                        # f32 accumulator scratch
                + 2 * tn * cp * 4                    # out tile, double-buffered
                + 2 * tn * cp * 4)                   # softmax temporaries
        if need <= budget:
            return tn
        tn //= 2
    return _SUBLANE


def _logreg_kernel(x_ref, w_ref, b_ref, out_ref):
    # One row tile: MXU matmul + bias + numerically stable row softmax, fused in VMEM.
    logits = jnp.dot(x_ref[...], w_ref[...],
                     preferred_element_type=jnp.float32) + b_ref[...]
    m = jnp.max(logits, axis=1, keepdims=True)
    e = jnp.exp(logits - m)                            # padded class lanes -> exp == 0
    denom = jnp.sum(e, axis=1, keepdims=True)
    inv = pl.reciprocal(denom, approx=False)           # exact to hold 1e-5 tolerance
    out_ref[...] = (e * inv).astype(out_ref.dtype)


def _logreg_kernel_ktiled(x_ref, w_ref, b_ref, out_ref, acc_ref):
    # Fallback for huge D*C: accumulate X@W over a K grid axis, finalize softmax at the end.
    k = pl.program_id(1)

    @pl.when(k == 0)
    def _():
        acc_ref[...] = jnp.zeros_like(acc_ref)

    acc_ref[...] += jnp.dot(x_ref[...], w_ref[...],
                            preferred_element_type=jnp.float32)

    @pl.when(k == pl.num_programs(1) - 1)
    def _():
        logits = acc_ref[...] + b_ref[...]
        m = jnp.max(logits, axis=1, keepdims=True)
        e = jnp.exp(logits - m)
        denom = jnp.sum(e, axis=1, keepdims=True)
        out_ref[...] = (e * pl.reciprocal(denom, approx=False)).astype(out_ref.dtype)


def pt_logreg_forward(x, w, b, *, block_rows=None, block_k=None,
                      compute_dtype=jnp.float32, out_dtype=jnp.float32):
    """softmax(x @ w + b, axis=1). x:[N,D], w:[D,C], b:[C] -> probs [N,C]."""
    N, D = x.shape
    Dw, C = w.shape
    assert D == Dw and b.shape == (C,)

    Cp = _round_up(max(C, 1), _LANE)                 # lane-dense class dim (output/W/B only)
    itemsize = jnp.dtype(compute_dtype).itemsize
    n8 = _round_up(N, _SUBLANE)

    vmem_limit = _vmem_limit_bytes()
    tile_budget = (vmem_limit * 4) // 5              # size tiles against ~80% of the limit

    xc = x.astype(compute_dtype)                     # no spatial padding of X on the resident-W path
    bp = jnp.full((1, Cp), _NEG_BIG, jnp.float32).at[0, :C].set(b.astype(jnp.float32))

    tn_auto = _pick_row_tile(D, Cp, itemsize, tile_budget)
    use_ktiling = (block_k is not None) or (tn_auto is None)

    if not use_ktiling:
        tn = block_rows if block_rows is not None else tn_auto
        tn = max(_SUBLANE, min(_round_up(tn, _SUBLANE), n8))
        wp = jnp.zeros((D, Cp), compute_dtype).at[:, :C].set(w.astype(compute_dtype))
        out = pl.pallas_call(
            _logreg_kernel,
            out_shape=jax.ShapeDtypeStruct((N, Cp), out_dtype),
            grid=(pl.cdiv(N, tn),),                  # ragged tail block handled by Pallas masking
            in_specs=[
                pl.BlockSpec((tn, D), lambda i: (i, 0)),   # X row tile, streamed unpadded
                pl.BlockSpec((D, Cp), lambda i: (0, 0)),   # W resident across the grid
                pl.BlockSpec((1, Cp), lambda i: (0, 0)),   # B resident across the grid
            ],
            out_specs=pl.BlockSpec((tn, Cp), lambda i: (i, 0)),
            compiler_params=pltpu.CompilerParams(
                dimension_semantics=("parallel",),
                vmem_limit_bytes=vmem_limit,
            ),
        )(xc, wp, bp)
    else:
        # K-tiled path: W (or X K-slabs) would not fit VMEM-resident.  The contraction
        # dim must be zero-padded to a TK multiple (Pallas pads ragged blocks with
        # unspecified data, which must not reach the accumulator).
        tk = _round_up(block_k if block_k is not None else 512, _LANE)
        tk = min(tk, _round_up(D, _LANE))
        Dp = _round_up(D, tk)
        tn = (block_rows if block_rows is not None
              else _pick_ktiled_row_tile(tk, Cp, itemsize, tile_budget))
        tn = max(_SUBLANE, min(_round_up(tn, _SUBLANE), n8))
        xp = jnp.zeros((N, Dp), compute_dtype).at[:, :D].set(xc)
        wp = jnp.zeros((Dp, Cp), compute_dtype).at[:D, :C].set(w.astype(compute_dtype))
        out = pl.pallas_call(
            _logreg_kernel_ktiled,
            out_shape=jax.ShapeDtypeStruct((N, Cp), out_dtype),
            grid=(pl.cdiv(N, tn), Dp // tk),         # reduction (K) axis innermost
            in_specs=[
                pl.BlockSpec((tn, tk), lambda i, k: (i, k)),
                pl.BlockSpec((tk, Cp), lambda i, k: (k, 0)),
                pl.BlockSpec((1, Cp), lambda i, k: (0, 0)),
            ],
            out_specs=pl.BlockSpec((tn, Cp), lambda i, k: (i, 0)),
            scratch_shapes=[pltpu.VMEM((tn, Cp), jnp.float32)],
            compiler_params=pltpu.CompilerParams(
                dimension_semantics=("parallel", "arbitrary"),
                vmem_limit_bytes=vmem_limit,
            ),
        )(xp, wp, bp)

    return out if Cp == C else out[:, :C]


if __name__ == "__main__":
    key = jax.random.PRNGKey(0)
    kx, kw, kx2, kw2, kx3, kw3 = jax.random.split(key, 6)

    # Test 1: module-sized toy check (PTLogreg(D=32, C=4)), f32, single row tile.
    N, D, C = 8, 32, 4
    W = jax.random.normal(kw, (D, C), dtype=jnp.float32)    # ~ torch.randn((D, C))
    B = jnp.zeros((C,), dtype=jnp.float32)                  # ~ torch.zeros(C)
    X = jax.random.normal(kx, (N, D), dtype=jnp.float32)
    probs = jax.block_until_ready(pt_logreg_forward(X, W, B))
    ref = jax.nn.softmax(X @ W + B[None, :], axis=1)
    assert probs.shape == (N, C)
    assert jnp.allclose(probs, ref, atol=1e-5, rtol=1e-5)
    assert jnp.allclose(jnp.sum(probs, axis=1), 1.0, atol=1e-5)

    # Test 2: non-aligned N/D/C, unpadded-X streaming, multi-tile row grid + ragged tail.
    N2, D2, C2 = 300, 100, 10
    X2 = jax.random.normal(kx2, (N2, D2), dtype=jnp.float32)
    W2 = jax.random.normal(kw2, (D2, C2), dtype=jnp.float32)
    B2 = jnp.linspace(-1.0, 1.0, C2, dtype=jnp.float32)
    probs2 = jax.block_until_ready(pt_logreg_forward(X2, W2, B2, block_rows=128))
    ref2 = jax.nn.softmax(X2 @ W2 + B2[None, :], axis=1)
    assert probs2.shape == (N2, C2)
    assert jnp.allclose(probs2, ref2, atol=1e-5, rtol=1e-5)
    assert jnp.allclose(jnp.sum(probs2, axis=1), 1.0, atol=1e-5)

    # Test 3: forced K-tiled fallback path (used when W can't be VMEM-resident, e.g. v7x).
    N3, D3, C3 = 96, 300, 40
    X3 = jax.random.normal(kx3, (N3, D3), dtype=jnp.float32)
    W3 = jax.random.normal(kw3, (D3, C3), dtype=jnp.float32)
    B3 = jnp.linspace(-0.5, 0.5, C3, dtype=jnp.float32)
    probs3 = jax.block_until_ready(
        pt_logreg_forward(X3, W3, B3, block_rows=64, block_k=128))
    ref3 = jax.nn.softmax(X3 @ W3 + B3[None, :], axis=1)
    assert probs3.shape == (N3, C3)
    assert jnp.allclose(probs3, ref3, atol=2e-4, rtol=2e-4)
    assert jnp.allclose(jnp.sum(probs3, axis=1), 1.0, atol=1e-5)

    # Test 4: bf16 inputs (recommended at real sizes; halves HBM read traffic),
    # softmax math stays f32 so rows still sum to 1 exactly.
    probs4 = jax.block_until_ready(
        pt_logreg_forward(X2, W2, B2, compute_dtype=jnp.bfloat16))
    assert probs4.shape == (N2, C2)
    assert float(jnp.max(jnp.abs(probs4 - ref2))) < 8e-2    # bf16 input rounding
    assert jnp.allclose(jnp.sum(probs4, axis=1), 1.0, atol=1e-5)

    print("KERNEL_OK")
</pallas_src>

<mosaic_0001>
module attributes {stable_mosaic.version = 11 : i64} {
  func.func @_logreg_kernel(%arg0: i32, %arg1: memref<8x32xf32, #tpu.memory_space<vmem>>, %arg2: memref<32x128xf32, #tpu.memory_space<vmem>>, %arg3: memref<1x128xf32, #tpu.memory_space<vmem>>, %arg4: memref<8x128xf32, #tpu.memory_space<vmem>>) attributes {dimension_semantics = [#tpu.dimension_semantics<parallel>], iteration_bounds = array<i64: 1>, scalar_prefetch = 0 : i64, scratch_operands = 0 : i64, tpu.core_type = #tpu.core_type<tc>, window_params = [{transform_indices = @transform_0, window_bounds = array<i64: 8, 32>}, {pipeline_mode = #tpu.pipeline_mode<synchronous>, transform_indices = @transform_1, window_bounds = array<i64: 32, 128>}, {pipeline_mode = #tpu.pipeline_mode<synchronous>, transform_indices = @transform_2, window_bounds = array<i64: 1, 128>}, {transform_indices = @transform_3, window_bounds = array<i64: 8, 128>}]} {
    %c0 = arith.constant 0 : index
    %c0_0 = arith.constant 0 : index
    %0 = vector.load %arg1[%c0, %c0_0] : memref<8x32xf32, #tpu.memory_space<vmem>>, vector<8x32xf32>
    %c0_1 = arith.constant 0 : index
    %c0_2 = arith.constant 0 : index
    %1 = vector.load %arg2[%c0_1, %c0_2] : memref<32x128xf32, #tpu.memory_space<vmem>>, vector<32x128xf32>
    %cst = arith.constant dense<0.000000e+00> : vector<8x128xf32>
    %2 = tpu.matmul %0, %1, %cst {dimension_numbers = #tpu.dot_dimension_numbers<[1], [0], [0], [1], [0, 0, 1, 1], [], []>} : vector<8x32xf32>, vector<32x128xf32>, vector<8x128xf32> -> vector<8x128xf32>
    %c0_3 = arith.constant 0 : index
    %c0_4 = arith.constant 0 : index
    %3 = vector.load %arg3[%c0_3, %c0_4] : memref<1x128xf32, #tpu.memory_space<vmem>>, vector<1x128xf32>
    %4 = vector.broadcast %3 : vector<1x128xf32> to vector<8x128xf32>
    %5 = arith.addf %2, %4 : vector<8x128xf32>
    %cst_5 = arith.constant dense<0xFF800000> : vector<8xf32>
    %6 = vector.multi_reduction <maximumf>, %5, %cst_5 [1] : vector<8x128xf32> to vector<8xf32>
    %7 = vector.shape_cast %6 : vector<8xf32> to vector<8x1xf32>
    %8 = vector.broadcast %7 : vector<8x1xf32> to vector<8x128xf32>
    %9 = arith.subf %5, %8 : vector<8x128xf32>
    %10 = math.exp %9 : vector<8x128xf32>
    %cst_6 = arith.constant dense<0.000000e+00> : vector<8xf32>
    %11 = vector.multi_reduction <add>, %10, %cst_6 [1] : vector<8x128xf32> to vector<8xf32>
    %12 = vector.shape_cast %11 : vector<8xf32> to vector<8x1xf32>
    %13 = tpu.reciprocal %12 : vector<8x1xf32> -> vector<8x1xf32>
    %14 = vector.broadcast %13 : vector<8x1xf32> to vector<8x128xf32>
    %15 = arith.mulf %10, %14 : vector<8x128xf32>
    %c0_7 = arith.constant 0 : index
    %c0_8 = arith.constant 0 : index
    %16 = vector.load %arg4[%c0_7, %c0_8] : memref<8x128xf32, #tpu.memory_space<vmem>>, vector<8x128xf32>
    tpu.vector_store %arg4[%c0_7, %c0_8], %15 {strides = array<i32>} : memref<8x128xf32, #tpu.memory_space<vmem>>, vector<8x128xf32>,
    return
  }
  func.func @transform_0(%arg0: i32) -> (i32, i32) {
    %c0_i32 = arith.constant 0 : i32
    %c0_i32_0 = arith.constant 0 : i32
    return %arg0, %c0_i32 : i32, i32
  }
  func.func @transform_1(%arg0: i32) -> (i32, i32) {
    %c0_i32 = arith.constant 0 : i32
    %c0_i32_0 = arith.constant 0 : i32
    %c0_i32_1 = arith.constant 0 : i32
    return %c0_i32, %c0_i32_0 : i32, i32
  }
  func.func @transform_2(%arg0: i32) -> (i32, i32) {
    %c0_i32 = arith.constant 0 : i32
    %c0_i32_0 = arith.constant 0 : i32
    %c0_i32_1 = arith.constant 0 : i32
    return %c0_i32, %c0_i32_0 : i32, i32
  }
  func.func @transform_3(%arg0: i32) -> (i32, i32) {
    %c0_i32 = arith.constant 0 : i32
    %c0_i32_0 = arith.constant 0 : i32
    return %arg0, %c0_i32 : i32, i32
  }
}

</mosaic_0001>

<bundles_post_ra>
// kernel: tpu_custom_call.1
= control target key start
LH: loop header
LB: loop body
LE: loop exit
PB: predicated region body
PF: predicated region fallthrough
CT: control target
= control target key end

     0   :  { %8 = vsyncpa [#allocation3], 0  ;;  %s372_s0 = inlined_call_operand.hbm [shape: f32[8,32], index: 0, kind: input, shape index: {}]   ;;  %s373_s1 = inlined_call_operand.hbm [shape: f32[32,128], index: 1, kind: input, shape index: {}]   ;;  %s374_s2 = inlined_call_operand.hbm [shape: f32[1,128], index: 2, kind: input, shape index: {}]   ;;  %s375_s3 = inlined_call_operand.hbm [shape: f32[8,128], index: 3, kind: output, shape index: {}]  }
   0x1   :  { %9 = vsyncpa [#allocation6], 0 }
   0x2   :  { %10 = vsyncpa [#allocation4], 0  ;;  %s295_s12 = smov [#allocation5]   ;;  %s201_s16 = scalar_lea.hbm %s373_s1, 512 }
   0x3   :  { %s26_s13 = sshll.u32 %s295_s12, 4  ;;  %p202_p0 = scmp.ne.s32.totalorder %s373_s1, %s201_s16  ;;  %s27_s13 = int_to_ptr.vmem [resolvable:$true] %s26_s13 }
   0x4   :  { %p205_p1 = scmp.lt.u32.totalorder %s201_s16, %s373_s1 }
   0x6   :  { %p207_p2 = pnand %p205_p1, %p202_p0 }
   0x8   :  { %210 = shalt.err (!%p207_p2)
}
   0x9   :  { %s211_s21 = scalar_lea.vmem %s27_s13, 512  ;;  %p216_p4 = scmp.lt.s32.totalorder %s27_s13, %s27_s13 }
   0xa   :  { %p212_p3 = scmp.ne.s32.totalorder %s27_s13, %s211_s21  ;;  %p217_p5 = scmp.lt.s32.totalorder %s211_s21, %s211_s21 }
   0xc   :  { %p218_p6 = por %p217_p5, %p216_p4 }
   0xe   :  { %p219_p7 = pnand %p218_p6, %p212_p3 }
  0x10   :  { %222 = shalt.err (!%p219_p7)
}
  0x11   :  { %s296_s22 = smov 128   ;;  %s297_s23 = smov 8  }
  0x12   :  { %32 = dma.hbm_to_vmem [thread:$0]  %s373_s1, 512, %s27_s13, [#allocation6], %s296_s22, %s296_s22, %s297_s23  }
  0x13   :  { %s298_s26 = smov [#allocation2]   ;;  %s299_s28 = smov [#allocation7]  }
  0x14   :  { %s17_s27 = sshll.u32 %s298_s26, 4  ;;  %s39_s29 = sshll.u32 %s299_s28, 4  ;;  %s18_s27 = int_to_ptr.vmem [resolvable:$true] %s17_s27  ;;  %s40_s29 = int_to_ptr.vmem [resolvable:$true] %s39_s29 }
  0x15   :  { %s223_s5 = scalar_lea.hbm %s372_s0, 128 }
  0x16   :  { %p224_p8 = scmp.ne.s32.totalorder %s372_s0, %s223_s5  ;;  %p227_p9 = scmp.lt.u32.totalorder %s223_s5, %s372_s0 }
  0x18   :  { %p229_p10 = pnand %p227_p9, %p224_p8 }
  0x1a   :  { %232 = shalt.err (!%p229_p10)
}
  0x1b   :  { %s233_s1 = scalar_lea.vmem %s18_s27, 128  ;;  %p238_p12 = scmp.lt.s32.totalorder %s18_s27, %s18_s27 }
  0x1c   :  { %p234_p11 = scmp.ne.s32.totalorder %s18_s27, %s233_s1  ;;  %p239_p13 = scmp.lt.s32.totalorder %s233_s1, %s233_s1 }
  0x1e   :  { %p240_p0 = por %p239_p13, %p238_p12 }
  0x20   :  { %p241_p1 = pnand %p240_p0, %p234_p11 }
  0x22   :  { %244 = shalt.err (!%p241_p1)
}
  0x23   :  { %20 = dma.hbm_to_vmem [thread:$0]  %s372_s0, 128, %s18_s27, [#allocation3]  }
  0x24   :  { %s245_s14 = scalar_lea.hbm %s374_s2, 16 }
  0x25   :  { %p246_p2 = scmp.ne.s32.totalorder %s374_s2, %s245_s14  ;;  %p249_p3 = scmp.lt.u32.totalorder %s245_s14, %s374_s2 }
  0x27   :  { %p251_p4 = pnand %p249_p3, %p246_p2 }
  0x29   :  { %254 = shalt.err (!%p251_p4)
}
  0x2a   :  { %s255_s19 = scalar_lea.vmem %s40_s29, 16  ;;  %s259_s20 = scalar_lea.vmem %s40_s29, 32 }
  0x2b   :  { %p256_p5 = scmp.ne.s32.totalorder %s40_s29, %s255_s19  ;;  %p260_p6 = scmp.lt.s32.totalorder %s40_s29, %s40_s29 }
  0x2c   :  { %p261_p7 = scmp.lt.s32.totalorder %s259_s20, %s255_s19 }
  0x2e   :  { %p262_p8 = por %p261_p7, %p260_p6 }
  0x30   :  { %p263_p9 = pnand %p262_p8, %p256_p5 }
  0x32   :  { %266 = shalt.err (!%p263_p9)
}
  0x33   :  { %42 = dma.hbm_to_vmem [thread:$0]  %s374_s2, 16, %s40_s29, [#allocation6]  }
  0x34   :  { %289 = dma.done.wait [#allocation3], 128  }
  0x35   :  { %290 = vsyncadd [#allocation3], 4294967168 }
  0x36   :  { %291 = dma.done.wait [#allocation6], 528  }
  0x37   :  { %292 = vsyncadd [#allocation6], 4294966768  ;;  %v300_v0 = vmov 0.0|0.0   ;;  %vm301_vm0 = vmmov 0   ;;  %v302_v1 = vmov 0.0   ;;  %v53_v2 = vld [vmem:[#allocation5] sm:$0xff] }
  0x38   :  { %182 = vmatprep.subr.bf16.mxu0 %v300_v0  ;;  %179 = vmatprep.mubr.msk.f32.mxu0 %vm301_vm0, %v302_v1  ;;  %v54_v3 = vld [vmem:[#allocation5 + $0x8] sm:$0xff]  ;;  %v55_v4 = vld [vmem:[#allocation5 + $0x10] sm:$0xff]  ;;  %v56_v6 = vld [vmem:[#allocation5 + $0x18] sm:$0xff]  ;;  %vm64_vm1 = vcmask 261120   ;;  %s303_s2 = smov [#allocation8]  }
  0x39   :  { %v183_v5 = vpack.c.bf16 %v54_v3, %v53_v2  ;;  %v186_v7 = vpack.c.bf16 %v56_v6, %v55_v4  ;;  %v52_v8 = vld [vmem:[#allocation2] sm:$0xff]  ;;  %v164_v9 = vld [vmem:[#allocation7] ss:$0 sm:$0xff]  ;;  %s154_s22 = sshll.u32 %s303_s2, 4  ;;  %s155_s22 = int_to_ptr.vmem [resolvable:$true] %s154_s22 }
  0x3a   :  { %s267_s23 = scalar_lea.vmem %s155_s22, 128  ;;  %p272_p11 = scmp.lt.s32.totalorder %s155_s22, %s155_s22 }
  0x3b   :  { %184 = vmatpush3.bf16.msra.mxu0 %v183_v5  ;;  %p268_p10 = scmp.ne.s32.totalorder %s155_s22, %s267_s23  ;;  %p273_p12 = scmp.lt.s32.totalorder %s267_s23, %s267_s23 }
  0x3c   :  { %185 = vmatprep.subr.bf16.mxu0 %v300_v0 }
  0x3d   :  { %p274_p13 = por %p273_p12, %p272_p11 }
  0x3f   :  { %187 = vmatpush3.bf16.msra.mxu0 %v186_v7  ;;  %p275_p0 = pnand %p274_p13, %p268_p10 }
  0x42   :  { %180 = vmatmul.mubr.msk.f32.vlgmr.msra.gmra.mrb[0].mxu0 %vm64_vm1, %v52_v8 }
 0x115   :  { %v134_v10 = vpop.f32.mrb[0].mxu0 }
 0x116   :  { %v135_v11 = vadd.f32 %v164_v9, %v134_v10  ;;  %v181_v12 = vpop.f32.mrb[1].mxu0 }
 0x118   :  { %138 = vmax.xlane.f32.xlu0 %v135_v11 }
 0x1a5   :  { %v139_v13 = vpop.xlane.xlu0 %138 }
 0x1a6   :  { %v140_v14 = vsub.f32 %v135_v11, %v139_v13 }
 0x1a8   :  { %v141_v15 = vmul.f32 1.442695, %v140_v14 }
 0x1aa   :  { %197 = vpow2.f32 %v141_v15 }
 0x1b4   :  { %v198_v16 = vpop.eup %197 }
 0x1b5   :  { %143 = vadd.xlane.f32.xlu0 %v198_v16 }
 0x242   :  { %v144_v17 = vpop.xlane.xlu0 %143 }
 0x243   :  { %199 = vrcp.f32 %v144_v17 }
 0x24d   :  { %v200_v18 = vpop.eup %199 }
 0x24e   :  { %v146_v19 = vmul.f32 %v200_v18, %v198_v16 }
 0x250   :  { %147 = vst [vmem:[#allocation8] sm:$0xff] %v146_v19 }
 0x251   :  { %278 = shalt.err (!%p275_p0)
}
 0x252   :  { %s279_s26 = scalar_lea.hbm %s375_s3, 128 }
 0x253   :  { %p280_p1 = scmp.ne.s32.totalorder %s375_s3, %s279_s26  ;;  %p283_p2 = scmp.lt.u32.totalorder %s279_s26, %s375_s3 }
 0x255   :  { %p285_p3 = pnand %p283_p2, %p280_p1 }
 0x257   :  { %288 = shalt.err (!%p285_p3)
}
 0x258   :  { %157 = dma.vmem_to_hbm [thread:$0]  %s155_s22, 128, %s375_s3, [#allocation4]  }
 0x259   :  { %293 = dma.done.wait [#allocation4], 128  }
 0x25a   :  { %294 = vsyncadd [#allocation4], 4294967168 }
 0x25b   :  { %161 = vsyncpa [#allocation3], 1 }
 0x25c   :  { %162 = vsyncpa [#allocation6], 1 }
 0x25d   :  { %163 = vsyncpa [#allocation4], 1 }

</bundles_post_ra>
